<compile_context>
chip_gen: v5e
topology: v5e:2x2
jax: 0.10.0
libtpu: 0.0.40
codegen_flags: <defaults>
</compile_context>

<pallas_src>
import jax
import jax.numpy as jnp
import numpy as np
from jax.experimental import pallas as pl
from jax.experimental.pallas import tpu as pltpu


def _round_up(x: int, m: int) -> int:
    return (x + m - 1) // m * m


def dueling_dqn_kernel(x_ref,
                       we_ref, be_ref,
                       w1_ref, b1_ref,
                       wh_ref, bh_ref,
                       wv2_ref,
                       wa2_ref, ba2_ref,
                       q_ref):
    f32 = jnp.float32
    bf16 = jnp.bfloat16

    # --- shared embed, block-diagonal weights: one matmul gives sg directly.
    #     x is bf16 (TB, 2D_pad); padded feature rows of we_blk are zero.
    sg = jnp.maximum(
        jnp.dot(x_ref[...], we_ref[...], preferred_element_type=f32)
        + be_ref[...], 0.0)                                            # (TB, 256)

    # --- _ff_block: relu(linear1(sg)) + sg  (residual kept in f32).
    h = jnp.maximum(
        jnp.dot(sg.astype(bf16), w1_ref[...], preferred_element_type=f32)
        + b1_ref[...], 0.0) + sg                                       # (TB, 256)
    hb = h.astype(bf16)

    # --- fused first layers of the value (128) and advantage (256) heads.
    y = jnp.maximum(
        jnp.dot(hb, wh_ref[...], preferred_element_type=f32) + bh_ref[...], 0.0)
    v_h = y[:, :128]                                                   # (TB, 128)
    a_h = y[:, 128:]                                                   # (TB, 256)

    # --- value projection (128 -> 1) on VPU/XLU; bv2 was folded into ba2c.
    value = jnp.sum(v_h * wv2_ref[...], axis=-1, keepdims=True)        # (TB, 1)

    # --- centered advantage (dueling mean folded into wa2c/ba2c at pack time).
    #     Padded action columns of wa2c/ba2c are zero -> q padding = value,
    #     sliced off outside the kernel.
    q_ref[...] = (jnp.dot(a_h.astype(bf16), wa2_ref[...],
                          preferred_element_type=f32)
                  + ba2_ref[...]) + value


def pack_params(params, action_dim):
    """One-time conversion of f32 params into the kernel's fused/padded layout."""
    bf16 = jnp.bfloat16
    D = params["we"].shape[0]
    d2_pad = _round_up(2 * D, 128)
    a_pad = _round_up(action_dim, 128)

    # Block-diagonal embed weight: rows [0,D) -> state half (cols 0:128),
    # rows [D,2D) -> goal half (cols 128:256), padded rows are zero.
    we_blk = jnp.zeros((d2_pad, 256), jnp.float32)
    we_blk = we_blk.at[:D, :128].set(params["we"])
    we_blk = we_blk.at[D:2 * D, 128:].set(params["we"])
    be_blk = jnp.concatenate([params["be"], params["be"]], axis=1)     # (1, 256)

    # Fold the dueling mean (and bv2) into the advantage projection:
    #   q = v_raw + bv2 + a_h @ (wa2 - mean_cols(wa2)) + (ba2 - mean(ba2))
    wa2c = params["wa2"] - jnp.mean(params["wa2"], axis=1, keepdims=True)
    ba2c = (params["ba2"] - jnp.mean(params["ba2"], axis=1, keepdims=True)
            + params["bv2"])                                           # (1, A)
    wa2c = jnp.pad(wa2c, ((0, 0), (0, a_pad - action_dim)))
    ba2c = jnp.pad(ba2c, ((0, 0), (0, a_pad - action_dim)))

    return {
        "we": we_blk.astype(bf16),
        "be": be_blk,
        "w1": params["w1"].astype(bf16),
        "b1": params["b1"],
        # fused value/advantage first layers -> (256, 128 + 256)
        "wh": jnp.concatenate([params["wv1"], params["wa1"]], axis=1).astype(bf16),
        "bh": jnp.concatenate([params["bv1"], params["ba1"]], axis=1),
        # value projection kept f32 as a (1, 128) row for the VPU reduce
        "wv2": params["wv2"].reshape(1, -1).astype(jnp.float32),
        "wa2": wa2c.astype(bf16),
        "ba2": ba2c,
        "a_pad": a_pad,
        "d2_pad": d2_pad,
    }


def _pick_batch_tile(b_aligned: int) -> int:
    """Batch tile: big for v5e/v6e (amortize grid-step overhead), but ensure
    grid >= 2 on dual-TensorCore chips (v7x) so 'parallel' shards the batch."""
    cap = 512
    tb = min(cap, b_aligned)
    # Prefer an exact-fit tile to avoid gross over-padding at awkward B.
    while b_aligned % tb and tb > 16:
        tb -= 16
    try:
        dual_core = "v7" in jax.devices()[0].device_kind.lower()
    except Exception:  # pragma: no cover - device query is best-effort
        dual_core = False
    if dual_core and b_aligned >= 32 and b_aligned // tb < 2:
        tb = max(16, _round_up(tb // 2, 16))
    return tb


def dueling_dqn_forward(state, goal, packed, action_dim):
    B = state.shape[0]
    D = int(np.prod(state.shape[1:]))
    a_pad = packed["a_pad"]
    d2_pad = packed["d2_pad"]

    # Lane-dense bf16 input: state||goal on the feature axis, padded to 128.
    x = jnp.concatenate([state.reshape(B, D).astype(jnp.float32),
                         goal.reshape(B, D).astype(jnp.float32)], axis=1)

    b_aligned = _round_up(B, 16)            # bf16 sublane pack = 16 rows
    tb = _pick_batch_tile(b_aligned)
    b_pad = _round_up(b_aligned, tb)
    x = jnp.pad(x, ((0, b_pad - B), (0, d2_pad - 2 * D))).astype(jnp.bfloat16)

    def full_spec(arr):
        # Whole-array block; same block index every grid step -> stays VMEM-resident.
        return pl.BlockSpec(arr.shape, lambda i: (0,) * arr.ndim)

    weight_names = ("we", "be", "w1", "b1", "wh", "bh", "wv2", "wa2", "ba2")
    weights = [packed[n] for n in weight_names]

    q_pad = pl.pallas_call(
        dueling_dqn_kernel,
        out_shape=jax.ShapeDtypeStruct((b_pad, a_pad), jnp.float32),
        grid=(b_pad // tb,),
        in_specs=[pl.BlockSpec((tb, d2_pad), lambda i: (i, 0))]
                 + [full_spec(w) for w in weights],
        out_specs=pl.BlockSpec((tb, a_pad), lambda i: (i, 0)),
        compiler_params=pltpu.CompilerParams(
            dimension_semantics=("parallel",)),
    )(x, *weights)

    return q_pad[:B, :action_dim]


def init_params(key, obs_dim, action_dim):
    """Deterministic init mimicking nn.Linear's uniform(-1/sqrt(fan_in), ...)."""
    D = int(np.prod(obs_dim))

    def linear(key, fan_in, fan_out):
        k1, k2 = jax.random.split(key)
        bound = 1.0 / np.sqrt(fan_in)
        w = jax.random.uniform(k1, (fan_in, fan_out), jnp.float32, -bound, bound)
        b = jax.random.uniform(k2, (1, fan_out), jnp.float32, -bound, bound)
        return w, b

    keys = jax.random.split(key, 6)
    p = {}
    p["we"], p["be"] = linear(keys[0], D, 128)              # embed_linear
    p["w1"], p["b1"] = linear(keys[1], 256, 256)            # linear1
    p["wv1"], p["bv1"] = linear(keys[2], 256, 128)          # value_layer[0]
    p["wv2"], p["bv2"] = linear(keys[3], 128, 1)            # value_layer[2]
    p["wa1"], p["ba1"] = linear(keys[4], 256, 256)          # advantage_layer[0]
    p["wa2"], p["ba2"] = linear(keys[5], 256, action_dim)   # advantage_layer[2]
    return p


def reference_forward(state, goal, p):
    """Pure-JAX f32 reference of the PyTorch forward (true semantics)."""
    B = state.shape[0]
    s = state.reshape(B, -1)
    g = goal.reshape(B, -1)
    s_ft = jnp.maximum(s @ p["we"] + p["be"], 0.0)
    g_ft = jnp.maximum(g @ p["we"] + p["be"], 0.0)
    sg = jnp.concatenate([s_ft, g_ft], axis=1)
    h = jnp.maximum(sg @ p["w1"] + p["b1"], 0.0) + sg
    v = jnp.maximum(h @ p["wv1"] + p["bv1"], 0.0) @ p["wv2"] + p["bv2"]
    a = jnp.maximum(h @ p["wa1"] + p["ba1"], 0.0) @ p["wa2"] + p["ba2"]
    return v + a - jnp.mean(a, axis=-1, keepdims=True)


if __name__ == "__main__":
    obs_dim = (5, 10)      # prod = 50 input features per observation
    action_dim = 64
    batch = 4

    key = jax.random.PRNGKey(0)
    k_param, k_state, k_goal = jax.random.split(key, 3)

    params = init_params(k_param, obs_dim, action_dim)
    packed = pack_params(params, action_dim)

    state = jax.random.normal(k_state, (batch,) + obs_dim, jnp.float32)
    goal = jax.random.normal(k_goal, (batch,) + obs_dim, jnp.float32)

    q = dueling_dqn_forward(state, goal, packed, action_dim)
    q = jax.block_until_ready(q)

    q_ref = reference_forward(state, goal, params)
    # Tolerance loosened vs a pure-f32 kernel: MXU operands (inputs + weights)
    # are bf16 with f32 accumulation; observed error is ~1e-3..1e-2 at these scales.
    np.testing.assert_allclose(np.asarray(q), np.asarray(q_ref), rtol=5e-2, atol=5e-2)

    print("KERNEL_OK")
</pallas_src>

<mosaic_0001>
module attributes {stable_mosaic.version = 11 : i64} {
  func.func @dueling_dqn_kernel(%arg0: i32, %arg1: memref<16x128xbf16, #tpu.memory_space<vmem>>, %arg2: memref<128x256xbf16, #tpu.memory_space<vmem>>, %arg3: memref<1x256xf32, #tpu.memory_space<vmem>>, %arg4: memref<256x256xbf16, #tpu.memory_space<vmem>>, %arg5: memref<1x256xf32, #tpu.memory_space<vmem>>, %arg6: memref<256x384xbf16, #tpu.memory_space<vmem>>, %arg7: memref<1x384xf32, #tpu.memory_space<vmem>>, %arg8: memref<1x128xf32, #tpu.memory_space<vmem>>, %arg9: memref<256x128xbf16, #tpu.memory_space<vmem>>, %arg10: memref<1x128xf32, #tpu.memory_space<vmem>>, %arg11: memref<16x128xf32, #tpu.memory_space<vmem>>) attributes {dimension_semantics = [#tpu.dimension_semantics<parallel>], iteration_bounds = array<i64: 1>, scalar_prefetch = 0 : i64, scratch_operands = 0 : i64, tpu.core_type = #tpu.core_type<tc>, window_params = [{transform_indices = @transform_0, window_bounds = array<i64: 16, 128>}, {pipeline_mode = #tpu.pipeline_mode<synchronous>, transform_indices = @transform_1, window_bounds = array<i64: 128, 256>}, {pipeline_mode = #tpu.pipeline_mode<synchronous>, transform_indices = @transform_2, window_bounds = array<i64: 1, 256>}, {pipeline_mode = #tpu.pipeline_mode<synchronous>, transform_indices = @transform_3, window_bounds = array<i64: 256, 256>}, {pipeline_mode = #tpu.pipeline_mode<synchronous>, transform_indices = @transform_4, window_bounds = array<i64: 1, 256>}, {pipeline_mode = #tpu.pipeline_mode<synchronous>, transform_indices = @transform_5, window_bounds = array<i64: 256, 384>}, {pipeline_mode = #tpu.pipeline_mode<synchronous>, transform_indices = @transform_6, window_bounds = array<i64: 1, 384>}, {pipeline_mode = #tpu.pipeline_mode<synchronous>, transform_indices = @transform_7, window_bounds = array<i64: 1, 128>}, {pipeline_mode = #tpu.pipeline_mode<synchronous>, transform_indices = @transform_8, window_bounds = array<i64: 256, 128>}, {pipeline_mode = #tpu.pipeline_mode<synchronous>, transform_indices = @transform_9, window_bounds = array<i64: 1, 128>}, {transform_indices = @transform_10, window_bounds = array<i64: 16, 128>}]} {
    %c0 = arith.constant 0 : index
    %c0_0 = arith.constant 0 : index
    %0 = vector.load %arg1[%c0, %c0_0] : memref<16x128xbf16, #tpu.memory_space<vmem>>, vector<16x128xbf16>
    %c0_1 = arith.constant 0 : index
    %c0_2 = arith.constant 0 : index
    %1 = vector.load %arg2[%c0_1, %c0_2] : memref<128x256xbf16, #tpu.memory_space<vmem>>, vector<128x256xbf16>
    %cst = arith.constant dense<0.000000e+00> : vector<16x256xf32>
    %2 = tpu.matmul %0, %1, %cst {dimension_numbers = #tpu.dot_dimension_numbers<[1], [0], [0], [1], [0, 0, 1, 1], [], []>} : vector<16x128xbf16>, vector<128x256xbf16>, vector<16x256xf32> -> vector<16x256xf32>
    %c0_3 = arith.constant 0 : index
    %c0_4 = arith.constant 0 : index
    %3 = vector.load %arg3[%c0_3, %c0_4] : memref<1x256xf32, #tpu.memory_space<vmem>>, vector<1x256xf32>
    %4 = vector.broadcast %3 : vector<1x256xf32> to vector<16x256xf32>
    %5 = arith.addf %2, %4 : vector<16x256xf32>
    %cst_5 = arith.constant 0.000000e+00 : f32
    %6 = vector.broadcast %cst_5 : f32 to vector<16x256xf32>
    %7 = arith.maximumf %5, %6 : vector<16x256xf32>
    %8 = arith.truncf %7 : vector<16x256xf32> to vector<16x256xbf16>
    %c0_6 = arith.constant 0 : index
    %c0_7 = arith.constant 0 : index
    %9 = vector.load %arg4[%c0_6, %c0_7] : memref<256x256xbf16, #tpu.memory_space<vmem>>, vector<256x256xbf16>
    %cst_8 = arith.constant dense<0.000000e+00> : vector<16x256xf32>
    %10 = tpu.matmul %8, %9, %cst_8 {dimension_numbers = #tpu.dot_dimension_numbers<[1], [0], [0], [1], [0, 0, 1, 1], [], []>} : vector<16x256xbf16>, vector<256x256xbf16>, vector<16x256xf32> -> vector<16x256xf32>
    %c0_9 = arith.constant 0 : index
    %c0_10 = arith.constant 0 : index
    %11 = vector.load %arg5[%c0_9, %c0_10] : memref<1x256xf32, #tpu.memory_space<vmem>>, vector<1x256xf32>
    %12 = vector.broadcast %11 : vector<1x256xf32> to vector<16x256xf32>
    %13 = arith.addf %10, %12 : vector<16x256xf32>
    %cst_11 = arith.constant 0.000000e+00 : f32
    %14 = vector.broadcast %cst_11 : f32 to vector<16x256xf32>
    %15 = arith.maximumf %13, %14 : vector<16x256xf32>
    %16 = arith.addf %15, %7 : vector<16x256xf32>
    %17 = arith.truncf %16 : vector<16x256xf32> to vector<16x256xbf16>
    %c0_12 = arith.constant 0 : index
    %c0_13 = arith.constant 0 : index
    %18 = vector.load %arg6[%c0_12, %c0_13] : memref<256x384xbf16, #tpu.memory_space<vmem>>, vector<256x384xbf16>
    %cst_14 = arith.constant dense<0.000000e+00> : vector<16x384xf32>
    %19 = tpu.matmul %17, %18, %cst_14 {dimension_numbers = #tpu.dot_dimension_numbers<[1], [0], [0], [1], [0, 0, 1, 1], [], []>} : vector<16x256xbf16>, vector<256x384xbf16>, vector<16x384xf32> -> vector<16x384xf32>
    %c0_15 = arith.constant 0 : index
    %c0_16 = arith.constant 0 : index
    %20 = vector.load %arg7[%c0_15, %c0_16] : memref<1x384xf32, #tpu.memory_space<vmem>>, vector<1x384xf32>
    %21 = vector.broadcast %20 : vector<1x384xf32> to vector<16x384xf32>
    %22 = arith.addf %19, %21 : vector<16x384xf32>
    %cst_17 = arith.constant 0.000000e+00 : f32
    %23 = vector.broadcast %cst_17 : f32 to vector<16x384xf32>
    %24 = arith.maximumf %22, %23 : vector<16x384xf32>
    %25 = vector.extract_strided_slice %24 {offsets = [0, 0], sizes = [16, 128], strides = [1, 1]} : vector<16x384xf32> to vector<16x128xf32>
    %26 = vector.extract_strided_slice %24 {offsets = [0, 128], sizes = [16, 256], strides = [1, 1]} : vector<16x384xf32> to vector<16x256xf32>
    %c0_18 = arith.constant 0 : index
    %c0_19 = arith.constant 0 : index
    %27 = vector.load %arg8[%c0_18, %c0_19] : memref<1x128xf32, #tpu.memory_space<vmem>>, vector<1x128xf32>
    %28 = vector.broadcast %27 : vector<1x128xf32> to vector<16x128xf32>
    %29 = arith.mulf %25, %28 : vector<16x128xf32>
    %cst_20 = arith.constant dense<0.000000e+00> : vector<16xf32>
    %30 = vector.multi_reduction <add>, %29, %cst_20 [1] : vector<16x128xf32> to vector<16xf32>
    %31 = vector.shape_cast %30 : vector<16xf32> to vector<16x1xf32>
    %32 = arith.truncf %26 : vector<16x256xf32> to vector<16x256xbf16>
    %c0_21 = arith.constant 0 : index
    %c0_22 = arith.constant 0 : index
    %33 = vector.load %arg9[%c0_21, %c0_22] : memref<256x128xbf16, #tpu.memory_space<vmem>>, vector<256x128xbf16>
    %cst_23 = arith.constant dense<0.000000e+00> : vector<16x128xf32>
    %34 = tpu.matmul %32, %33, %cst_23 {dimension_numbers = #tpu.dot_dimension_numbers<[1], [0], [0], [1], [0, 0, 1, 1], [], []>} : vector<16x256xbf16>, vector<256x128xbf16>, vector<16x128xf32> -> vector<16x128xf32>
    %c0_24 = arith.constant 0 : index
    %c0_25 = arith.constant 0 : index
    %35 = vector.load %arg10[%c0_24, %c0_25] : memref<1x128xf32, #tpu.memory_space<vmem>>, vector<1x128xf32>
    %36 = vector.broadcast %35 : vector<1x128xf32> to vector<16x128xf32>
    %37 = arith.addf %34, %36 : vector<16x128xf32>
    %38 = vector.broadcast %31 : vector<16x1xf32> to vector<16x128xf32>
    %39 = arith.addf %37, %38 : vector<16x128xf32>
    %c0_26 = arith.constant 0 : index
    %c0_27 = arith.constant 0 : index
    %40 = vector.load %arg11[%c0_26, %c0_27] : memref<16x128xf32, #tpu.memory_space<vmem>>, vector<16x128xf32>
    tpu.vector_store %arg11[%c0_26, %c0_27], %39 {strides = array<i32>} : memref<16x128xf32, #tpu.memory_space<vmem>>, vector<16x128xf32>,
    return
  }
  func.func @transform_0(%arg0: i32) -> (i32, i32) {
    %c0_i32 = arith.constant 0 : i32
    %c0_i32_0 = arith.constant 0 : i32
    return %arg0, %c0_i32 : i32, i32
  }
  func.func @transform_1(%arg0: i32) -> (i32, i32) {
    %c0_i32 = arith.constant 0 : i32
    %c0_i32_0 = arith.constant 0 : i32
    %c0_i32_1 = arith.constant 0 : i32
    return %c0_i32, %c0_i32_0 : i32, i32
  }
  func.func @transform_2(%arg0: i32) -> (i32, i32) {
    %c0_i32 = arith.constant 0 : i32
    %c0_i32_0 = arith.constant 0 : i32
    %c0_i32_1 = arith.constant 0 : i32
    return %c0_i32, %c0_i32_0 : i32, i32
  }
  func.func @transform_3(%arg0: i32) -> (i32, i32) {
    %c0_i32 = arith.constant 0 : i32
    %c0_i32_0 = arith.constant 0 : i32
    %c0_i32_1 = arith.constant 0 : i32
    return %c0_i32, %c0_i32_0 : i32, i32
  }
  func.func @transform_4(%arg0: i32) -> (i32, i32) {
    %c0_i32 = arith.constant 0 : i32
    %c0_i32_0 = arith.constant 0 : i32
    %c0_i32_1 = arith.constant 0 : i32
    return %c0_i32, %c0_i32_0 : i32, i32
  }
  func.func @transform_5(%arg0: i32) -> (i32, i32) {
    %c0_i32 = arith.constant 0 : i32
    %c0_i32_0 = arith.constant 0 : i32
    %c0_i32_1 = arith.constant 0 : i32
    return %c0_i32, %c0_i32_0 : i32, i32
  }
  func.func @transform_6(%arg0: i32) -> (i32, i32) {
    %c0_i32 = arith.constant 0 : i32
    %c0_i32_0 = arith.constant 0 : i32
    %c0_i32_1 = arith.constant 0 : i32
    return %c0_i32, %c0_i32_0 : i32, i32
  }
  func.func @transform_7(%arg0: i32) -> (i32, i32) {
    %c0_i32 = arith.constant 0 : i32
    %c0_i32_0 = arith.constant 0 : i32
    %c0_i32_1 = arith.constant 0 : i32
    return %c0_i32, %c0_i32_0 : i32, i32
  }
  func.func @transform_8(%arg0: i32) -> (i32, i32) {
    %c0_i32 = arith.constant 0 : i32
    %c0_i32_0 = arith.constant 0 : i32
    %c0_i32_1 = arith.constant 0 : i32
    return %c0_i32, %c0_i32_0 : i32, i32
  }
  func.func @transform_9(%arg0: i32) -> (i32, i32) {
    %c0_i32 = arith.constant 0 : i32
    %c0_i32_0 = arith.constant 0 : i32
    %c0_i32_1 = arith.constant 0 : i32
    return %c0_i32, %c0_i32_0 : i32, i32
  }
  func.func @transform_10(%arg0: i32) -> (i32, i32) {
    %c0_i32 = arith.constant 0 : i32
    %c0_i32_0 = arith.constant 0 : i32
    return %arg0, %c0_i32 : i32, i32
  }
}

</mosaic_0001>

<bundles_post_ra>
// kernel: tpu_custom_call.1
= control target key start
LH: loop header
LB: loop body
LE: loop exit
PB: predicated region body
PF: predicated region fallthrough
CT: control target
= control target key end

     0   :  { %15 = vsyncpa [#allocation3], 0  ;;  %s2048_s0 = inlined_call_operand.hbm [shape: bf16[16,128], index: 0, kind: input, shape index: {}]   ;;  %s2049_s1 = inlined_call_operand.hbm [shape: bf16[128,256], index: 1, kind: input, shape index: {}]   ;;  %s2050_s2 = inlined_call_operand.hbm [shape: f32[1,256], index: 2, kind: input, shape index: {}]   ;;  %s2051_s3 = inlined_call_operand.hbm [shape: bf16[256,256], index: 3, kind: input, shape index: {}]   ;;  %s2052_s4 = inlined_call_operand.vmem [shape: f32[1,256], index: 4, kind: input, shape index: {}]   ;;  %s2053_s5 = inlined_call_operand.hbm [shape: bf16[256,384], index: 5, kind: input, shape index: {}]   ;;  %s2054_s6 = inlined_call_operand.vmem [shape: f32[1,384], index: 6, kind: input, shape index: {}]   ;;  %s2055_s7 = inlined_call_operand.vmem [shape: f32[1,128], index: 7, kind: input, shape index: {}]   ;;  %s2056_s8 = inlined_call_operand.hbm [shape: bf16[256,128], index: 8, kind: input, shape index: {}]   ;;  %s2057_s9 = inlined_call_operand.vmem [shape: f32[1,128], index: 9, kind: input, shape index: {}]   ;;  %s2058_s10 = inlined_call_operand.hbm [shape: f32[16,128], index: 10, kind: output, shape index: {}]  }
   0x1   :  { %16 = vsyncpa [#allocation6], 0 }
   0x2   :  { %17 = vsyncpa [#allocation9], 0 }
   0x3   :  { %18 = vsyncpa [#allocation12], 0  ;;  %s37_s15 = sshll.u32 %s2049_s1, 4  ;;  %s38_s15 = int_to_ptr.hbm [resolvable:$true] %s37_s15 }
   0x4   :  { %19 = vsyncpa [#allocation4], 0  ;;  %s1910_s16 = smov [#allocation5]   ;;  %s61_s20 = sshll.u32 %s2051_s3, 4  ;;  %s62_s20 = int_to_ptr.hbm [resolvable:$true] %s61_s20 }
   0x5   :  { %s39_s17 = sshll.u32 %s1910_s16, 4  ;;  %s1911_s21 = smov 128   ;;  %s40_s17 = int_to_ptr.vmem [resolvable:$true] %s39_s17 }
   0x6   :  { %s1912_s22 = smov 8   ;;  %s1913_s23 = smov [#allocation8]  }
   0x7   :  { %45 = dma.hbm_to_vmem [thread:$0]  %s38_s15, 2048, %s40_s17, [#allocation6], %s1911_s21, %s1911_s21, %s1912_s22  }
   0x8   :  { %s63_s24 = sshll.u32 %s1913_s23, 4  ;;  %s24_s26 = sshll.u32 %s2048_s0, 4  ;;  %s64_s24 = int_to_ptr.vmem [resolvable:$true] %s63_s24  ;;  %s25_s26 = int_to_ptr.hbm [resolvable:$true] %s24_s26 }
   0x9   :  { %69 = dma.hbm_to_vmem [thread:$0]  %s62_s20, 4096, %s64_s24, [#allocation9], %s1911_s21, %s1911_s21, %s1912_s22  }
   0xa   :  { %s1914_s3 = smov [#allocation2]   ;;  %s51_s30 = sshll.u32 %s2050_s2, 4  ;;  %s52_s30 = int_to_ptr.hbm [resolvable:$true] %s51_s30 }
   0xb   :  { %s26_s27 = sshll.u32 %s1914_s3, 4  ;;  %s1915_s11 = smov 64   ;;  %s27_s27 = int_to_ptr.vmem [resolvable:$true] %s26_s27 }
   0xc   :  { %s1916_s12 = smov 4   ;;  %s1917_s13 = smov [#allocation7]  }
   0xd   :  { %32 = dma.hbm_to_vmem [thread:$0]  %s25_s26, 128, %s27_s27, [#allocation3], %s1915_s11, %s1915_s11, %s1916_s12  }
   0xe   :  { %s53_s14 = sshll.u32 %s1917_s13, 4  ;;  %s76_s16 = sshll.u32 %s2053_s5, 4  ;;  %s54_s14 = int_to_ptr.vmem [resolvable:$true] %s53_s14  ;;  %s77_s16 = int_to_ptr.hbm [resolvable:$true] %s76_s16 }
   0xf   :  { %56 = dma.hbm_to_vmem [thread:$0]  %s52_s30, 32, %s54_s14, [#allocation6]  }
  0x10   :  { %s1918_s17 = smov [#allocation10]   ;;  %s93_s2 = sshll.u32 %s2056_s8, 4  ;;  %s94_s2 = int_to_ptr.hbm [resolvable:$true] %s93_s2 }
  0x11   :  { %s78_s18 = sshll.u32 %s1918_s17, 4  ;;  %s1919_s23 = smov 192   ;;  %s79_s18 = int_to_ptr.vmem [resolvable:$true] %s78_s18 }
  0x12   :  { %s1920_s24 = smov 12   ;;  %s1921_s25 = smov [#allocation11]  }
  0x13   :  { %84 = dma.hbm_to_vmem [thread:$0]  %s77_s16, 6144, %s79_s18, [#allocation9], %s1919_s23, %s1919_s23, %s1920_s24  }
  0x14   :  { %s95_s1 = sshll.u32 %s1921_s25, 4  ;;  %s96_s1 = int_to_ptr.vmem [resolvable:$true] %s95_s1 }
  0x15   :  { %101 = dma.hbm_to_vmem [thread:$0]  %s94_s2, 2048, %s96_s1, [#allocation12], %s1915_s11, %s1915_s11, %s1916_s12  }
  0x16   :  { %1900 = dma.done.wait [#allocation3], 128  }
  0x17   :  { %1901 = vsyncadd [#allocation3], 4294967168 }
  0x18   :  { %1902 = dma.done.wait [#allocation6], 2080  }
  0x19   :  { %1903 = vsyncadd [#allocation6], 4294965216 }
  0x1a   :  { %1904 = dma.done.wait [#allocation9], 10240  }
  0x1b   :  { %1905 = vsyncadd [#allocation9], 4294957056 }
  0x1c   :  { %1906 = dma.done.wait [#allocation12], 2048  }
  0x1d   :  { %1907 = vsyncadd [#allocation12], 4294965248  ;;  %v1214_v0 = vld [vmem:[#allocation5 + $0x70] sm:$0xf]  ;;  %v1620_v1 = vld [vmem:[#allocation5 + $0x74] sm:$0xf0] }
  0x1e   :  { %v1619_v2 = vld [vmem:[#allocation5 + $0x74] sm:$0xf]  ;;  %v1215_v3 = vor.u32 %v1620_v1, %v1214_v0  ;;  %v1216_v4 = vld [vmem:[#allocation5 + $0x78] sm:$0xf0]  ;;  %v1206_v5 = vld [vmem:[#allocation5 + $0x60] sm:$0xf] }
  0x1f   :  { %v1618_v6 = vld [vmem:[#allocation5 + $0x64] sm:$0xf0]  ;;  %v1219_v7 = vor.u32 %v1619_v2, %v1216_v4  ;;  %v1617_v8 = vld [vmem:[#allocation5 + $0x64] sm:$0xf]  ;;  %v1208_v9 = vld [vmem:[#allocation5 + $0x68] sm:$0xf0] }
  0x20   :  { %238 = vmatpush.bf16.msra.mxu0 %v1215_v3  ;;  %v1207_v10 = vor.u32 %v1618_v6, %v1206_v5  ;;  %v1211_v11 = vor.u32 %v1617_v8, %v1208_v9  ;;  %v1198_v12 = vld [vmem:[#allocation5 + $0x50] sm:$0xf]  ;;  %v1616_v13 = vld [vmem:[#allocation5 + $0x54] sm:$0xf0]  ;;  %v1615_v14 = vld [vmem:[#allocation5 + $0x54] sm:$0xf] }
  0x21   :  { %252 = vmatpush.bf16.msra.mxu1 %v1219_v7  ;;  %v1200_v15 = vld [vmem:[#allocation5 + $0x58] sm:$0xf0]  ;;  %v1199_v16 = vor.u32 %v1616_v13, %v1198_v12  ;;  %v1190_v18 = vld [vmem:[#allocation5 + $0x40] sm:$0xf]  ;;  %v1614_v19 = vld [vmem:[#allocation5 + $0x44] sm:$0xf0] }
  0x22   :  { %v1203_v17 = vor.u32 %v1615_v14, %v1200_v15  ;;  %v1613_v20 = vld [vmem:[#allocation5 + $0x44] sm:$0xf]  ;;  %v1192_v21 = vld [vmem:[#allocation5 + $0x48] sm:$0xf0]  ;;  %v1191_v22 = vor.u32 %v1614_v19, %v1190_v18  ;;  %v1278_v23 = vld [vmem:[#allocation8 + $0x70] sm:$0xf] }
  0x23   :  { %v1636_v24 = vld [vmem:[#allocation8 + $0x74] sm:$0xf0]  ;;  %v1342_v25 = vld [vmem:[#allocation8 + $0xf0] sm:$0xf]  ;;  %v1195_v26 = vor.u32 %v1613_v20, %v1192_v21  ;;  %v1270_v34 = vld [vmem:[#allocation8 + $0x60] sm:$0xf] }
  0x24   :  { %239 = vmatpush.bf16.msra.mxu0 %v1207_v10  ;;  %v1182_v27 = vld [vmem:[#allocation5 + $0x30] sm:$0xf]  ;;  %v1612_v28 = vld [vmem:[#allocation5 + $0x34] sm:$0xf0]  ;;  %v1279_v29 = vor.u32 %v1636_v24, %v1278_v23  ;;  %v1611_v31 = vld [vmem:[#allocation5 + $0x34] sm:$0xf] }
  0x25   :  { %253 = vmatpush.bf16.msra.mxu1 %v1211_v11  ;;  %v1652_v30 = vld [vmem:[#allocation8 + $0xf4] sm:$0xf0]  ;;  %v1634_v35 = vld [vmem:[#allocation8 + $0x64] sm:$0xf0]  ;;  %v1334_v36 = vld [vmem:[#allocation8 + $0xe0] sm:$0xf]  ;;  %v1183_v38 = vor.u32 %v1612_v28, %v1182_v27 }
  0x26   :  { %v1184_v32 = vld [vmem:[#allocation5 + $0x38] sm:$0xf0]  ;;  %v1343_v33 = vor.u32 %v1652_v30, %v1342_v25  ;;  %470 = vmatpush.bf16.msra.mxu2 %v1279_v29  ;;  %v1650_v37 = vld [vmem:[#allocation8 + $0xe4] sm:$0xf0]  ;;  %v1174_v39 = vld [vmem:[#allocation5 + $0x20] sm:$0xf]  ;;  %v1271_v41 = vor.u32 %v1634_v35, %v1270_v34 }
  0x27   :  { %v1610_v40 = vld [vmem:[#allocation5 + $0x24] sm:$0xf0]  ;;  %v1335_v42 = vor.u32 %v1650_v37, %v1334_v36  ;;  %v1187_v43 = vor.u32 %v1611_v31, %v1184_v32  ;;  %v1609_v44 = vld [vmem:[#allocation5 + $0x24] sm:$0xf]  ;;  %v1262_v45 = vld [vmem:[#allocation8 + $0x50] sm:$0xf] }
  0x28   :  { %240 = vmatpush.bf16.msra.mxu0 %v1199_v16  ;;  %484 = vmatpush.bf16.msra.mxu3 %v1343_v33  ;;  %v1632_v46 = vld [vmem:[#allocation8 + $0x54] sm:$0xf0]  ;;  %v1176_v47 = vld [vmem:[#allocation5 + $0x28] sm:$0xf0]  ;;  %v1326_v48 = vld [vmem:[#allocation8 + $0xd0] sm:$0xf]  ;;  %v1175_v51 = vor.u32 %v1610_v40, %v1174_v39 }
  0x29   :  { %254 = vmatpush.bf16.msra.mxu1 %v1203_v17  ;;  %v1648_v49 = vld [vmem:[#allocation8 + $0xd4] sm:$0xf0]  ;;  %v1263_v50 = vor.u32 %v1632_v46, %v1262_v45  ;;  %v1166_v52 = vld [vmem:[#allocation5 + $0x10] sm:$0xf]  ;;  %v1254_v54 = vld [vmem:[#allocation8 + $0x40] sm:$0xf]  ;;  %v1179_v56 = vor.u32 %v1609_v44, %v1176_v47 }
  0x2a   :  { %471 = vmatpush.bf16.msra.mxu2 %v1271_v41  ;;  %v1327_v53 = vor.u32 %v1648_v49, %v1326_v48  ;;  %v1630_v55 = vld [vmem:[#allocation8 + $0x44] sm:$0xf0]  ;;  %v1608_v57 = vld [vmem:[#allocation5 + $0x14] sm:$0xf0]  ;;  %v1318_v58 = vld [vmem:[#allocation8 + $0xc0] sm:$0xf] }
  0x2b   :  { %v1646_v59 = vld [vmem:[#allocation8 + $0xc4] sm:$0xf0]  ;;  %v1607_v60 = vld [vmem:[#allocation5 + $0x14] sm:$0xf]  ;;  %v1168_v61 = vld [vmem:[#allocation5 + $0x18] sm:$0xf0]  ;;  %v1255_v62 = vor.u32 %v1630_v55, %v1254_v54  ;;  %v1167_v63 = vor.u32 %v1608_v57, %v1166_v52 }
  0x2c   :  { %241 = vmatpush.bf16.msra.mxu0 %v1191_v22  ;;  %485 = vmatpush.bf16.msra.mxu3 %v1335_v42  ;;  %v1319_v0 = vor.u32 %v1646_v59, %v1318_v58  ;;  %v1171_v1 = vor.u32 %v1607_v60, %v1168_v61  ;;  %v1158_v2 = vld [vmem:[#allocation5] sm:$0xf]  ;;  %v1606_v3 = vld [vmem:[#allocation5 + $0x4] sm:$0xf0]  ;;  %v1605_v4 = vld [vmem:[#allocation5 + $0x4] sm:$0xf] }
  0x2d   :  { %255 = vmatpush.bf16.msra.mxu1 %v1195_v26  ;;  %v1160_v5 = vld [vmem:[#allocation5 + $0x8] sm:$0xf0]  ;;  %v1635_v6 = vld [vmem:[#allocation8 + $0x74] sm:$0xf]  ;;  %v1280_v7 = vld [vmem:[#allocation8 + $0x78] sm:$0xf0]  ;;  %v1159_v10 = vor.u32 %v1606_v3, %v1158_v2 }
  0x2e   :  { %472 = vmatpush.bf16.msra.mxu2 %v1263_v50  ;;  %v1651_v8 = vld [vmem:[#allocation8 + $0xf4] sm:$0xf]  ;;  %v1344_v9 = vld [vmem:[#allocation8 + $0xf8] sm:$0xf0]  ;;  %v1163_v11 = vor.u32 %v1605_v4, %v1160_v5  ;;  %v1283_v12 = vor.u32 %v1635_v6, %v1280_v7  ;;  %v1633_v14 = vld [vmem:[#allocation8 + $0x64] sm:$0xf] }
  0x2f   :  { %v1347_v13 = vor.u32 %v1651_v8, %v1344_v9  ;;  %v1272_v15 = vld [vmem:[#allocation8 + $0x68] sm:$0xf0]  ;;  %v1604_v16 = vld [vmem:[#allocation2] sm:$0xff]  ;;  %v1649_v17 = vld [vmem:[#allocation8 + $0xe4] sm:$0xf]  ;;  %s1922_s28 = smov [#allocation13]  }
  0x30   :  { %242 = vmatpush.bf16.msra.mxu0 %v1183_v38  ;;  %486 = vmatpush.bf16.msra.mxu3 %v1327_v53  ;;  %v1336_v18 = vld [vmem:[#allocation8 + $0xe8] sm:$0xf0]  ;;  %v1275_v19 = vor.u32 %v1633_v14, %v1272_v15  ;;  %v1631_v21 = vld [vmem:[#allocation8 + $0x54] sm:$0xf]  ;;  %v1264_v22 = vld [vmem:[#allocation8 + $0x58] sm:$0xf0] }
  0x31   :  { %256 = vmatpush.bf16.msra.mxu1 %v1187_v43  ;;  %v1339_v20 = vor.u32 %v1649_v17, %v1336_v18  ;;  %v1647_v23 = vld [vmem:[#allocation8 + $0xd4] sm:$0xf]  ;;  %v1328_v24 = vld [vmem:[#allocation8 + $0xd8] sm:$0xf0]  ;;  %v1267_v25 = vor.u32 %v1631_v21, %v1264_v22  ;;  %v1629_v27 = vld [vmem:[#allocation8 + $0x44] sm:$0xf] }
  0x32   :  { %473 = vmatpush.bf16.msra.mxu2 %v1255_v62  ;;  %v1331_v26 = vor.u32 %v1647_v23, %v1328_v24  ;;  %v1256_v28 = vld [vmem:[#allocation8 + $0x48] sm:$0xf0]  ;;  %v1645_v29 = vld [vmem:[#allocation8 + $0xc4] sm:$0xf]  ;;  %v1246_v33 = vld [vmem:[#allocation8 + $0x30] sm:$0xf] }
  0x33   :  { %v1320_v30 = vld [vmem:[#allocation8 + $0xc8] sm:$0xf0]  ;;  %v1259_v31 = vor.u32 %v1629_v27, %v1256_v28  ;;  %v1628_v34 = vld [vmem:[#allocation8 + $0x34] sm:$0xf0]  ;;  %v1310_v35 = vld [vmem:[#allocation8 + $0xb0] sm:$0xf] }
  0x34   :  { %243 = vmatpush.bf16.msra.mxu0 %v1175_v51  ;;  %487 = vmatpush.bf16.msra.mxu3 %v1319_v0  ;;  %v1323_v32 = vor.u32 %v1645_v29, %v1320_v30  ;;  %v1247_v36 = vor.u32 %v1628_v34, %v1246_v33  ;;  %v1644_v37 = vld [vmem:[#allocation8 + $0xb4] sm:$0xf0]  ;;  %v1627_v38 = vld [vmem:[#allocation8 + $0x34] sm:$0xf]  ;;  %v1248_v39 = vld [vmem:[#allocation8 + $0x38] sm:$0xf0] }
  0x35   :  { %257 = vmatpush.bf16.msra.mxu1 %v1179_v56  ;;  %v1311_v40 = vor.u32 %v1644_v37, %v1310_v35  ;;  %v1251_v41 = vor.u32 %v1627_v38, %v1248_v39  ;;  %v1643_v42 = vld [vmem:[#allocation8 + $0xb4] sm:$0xf]  ;;  %v1312_v43 = vld [vmem:[#allocation8 + $0xb8] sm:$0xf0]  ;;  %v1238_v45 = vld [vmem:[#allocation8 + $0x20] sm:$0xf] }
  0x36   :  { %474 = vmatpush.bf16.msra.mxu2 %v1247_v36  ;;  %v1315_v44 = vor.u32 %v1643_v42, %v1312_v43  ;;  %v1626_v46 = vld [vmem:[#allocation8 + $0x24] sm:$0xf0]  ;;  %v1302_v48 = vld [vmem:[#allocation8 + $0xa0] sm:$0xf]  ;;  %v1625_v50 = vld [vmem:[#allocation8 + $0x24] sm:$0xf] }
  0x37   :  { %v1239_v47 = vor.u32 %v1626_v46, %v1238_v45  ;;  %v1642_v49 = vld [vmem:[#allocation8 + $0xa4] sm:$0xf0]  ;;  %v1240_v52 = vld [vmem:[#allocation8 + $0x28] sm:$0xf0]  ;;  %v1641_v53 = vld [vmem:[#allocation8 + $0xa4] sm:$0xf] }
  0x38   :  { %244 = vmatpush.bf16.msra.mxu0 %v1167_v63  ;;  %488 = vmatpush.bf16.msra.mxu3 %v1311_v40  ;;  %v1303_v51 = vor.u32 %v1642_v49, %v1302_v48  ;;  %v1304_v54 = vld [vmem:[#allocation8 + $0xa8] sm:$0xf0]  ;;  %v1243_v55 = vor.u32 %v1625_v50, %v1240_v52  ;;  %v1230_v57 = vld [vmem:[#allocation8 + $0x10] sm:$0xf]  ;;  %v1624_v58 = vld [vmem:[#allocation8 + $0x14] sm:$0xf0] }
  0x39   :  { %258 = vmatpush.bf16.msra.mxu1 %v1171_v1  ;;  %v1307_v56 = vor.u32 %v1641_v53, %v1304_v54  ;;  %v1294_v59 = vld [vmem:[#allocation8 + $0x90] sm:$0xf]  ;;  %v1231_v60 = vor.u32 %v1624_v58, %v1230_v57  ;;  %v1640_v61 = vld [vmem:[#allocation8 + $0x94] sm:$0xf0]  ;;  %v1623_v62 = vld [vmem:[#allocation8 + $0x14] sm:$0xf] }
  0x3a   :  { %475 = vmatpush.bf16.msra.mxu2 %v1239_v47  ;;  %v1232_v63 = vld [vmem:[#allocation8 + $0x18] sm:$0xf0]  ;;  %v1295_v0 = vor.u32 %v1640_v61, %v1294_v59  ;;  %v1639_v2 = vld [vmem:[#allocation8 + $0x94] sm:$0xf]  ;;  %v1222_v5 = vld [vmem:[#allocation8] sm:$0xf] }
  0x3b   :  { %v1235_v1 = vor.u32 %v1623_v62, %v1232_v63  ;;  %v1296_v3 = vld [vmem:[#allocation8 + $0x98] sm:$0xf0]  ;;  %v1622_v6 = vld [vmem:[#allocation8 + $0x4] sm:$0xf0]  ;;  %v1286_v7 = vld [vmem:[#allocation8 + $0x80] sm:$0xf] }
  0x3c   :  { %245 = vmatpush.bf16.msra.mxu0 %v1159_v10  ;;  %489 = vmatpush.bf16.msra.mxu3 %v1303_v51  ;;  %v1299_v4 = vor.u32 %v1639_v2, %v1296_v3  ;;  %v1223_v8 = vor.u32 %v1622_v6, %v1222_v5  ;;  %v1638_v9 = vld [vmem:[#allocation8 + $0x84] sm:$0xf0]  ;;  %v1621_v10 = vld [vmem:[#allocation8 + $0x4] sm:$0xf]  ;;  %v1288_v15 = vld [vmem:[#allocation8 + $0x88] sm:$0xf0] }
  0x3d   :  { %259 = vmatpush.bf16.msra.mxu1 %v1163_v11  ;;  %v1224_v11 = vld [vmem:[#allocation8 + $0x8] sm:$0xf0]  ;;  %v1637_v14 = vld [vmem:[#allocation8 + $0x84] sm:$0xf]  ;;  %v1530_v17 = vld [vmem:[#allocation10 + $0x168] sm:$0xf] }
  0x3e   :  { %476 = vmatpush.bf16.msra.mxu2 %v1231_v60  ;;  %v1699_v18 = vld [vmem:[#allocation10 + $0x170] sm:$0xf0]  ;;  %v1696_v21 = vld [vmem:[#allocation10 + $0x158] sm:$0xf0]  ;;  %v1434_v22 = vld [vmem:[#allocation10 + $0xa8] sm:$0xf] }
  0x3f   :  { %246 = vmatmul.bf16.vlgmr.msra.gmra.mxu0 %v1604_v16  ;;  %v1675_v23 = vld [vmem:[#allocation10 + $0xb0] sm:$0xf0]  ;;  %v1506_v27 = vld [vmem:[#allocation10 + $0x138] sm:$0xf]  ;;  %v1672_v28 = vld [vmem:[#allocation10 + $0x98] sm:$0xf0] }
  0x40   :  { %498 = vmatpush.bf16.msrb.mxu0 %v1283_v12  ;;  %260 = vmatmul.bf16.vlgmr.msra.gmra.mxu1 %v1604_v16  ;;  %v1287_v12 = vor.u32 %v1638_v9, %v1286_v7  ;;  %v1291_v16 = vor.u32 %v1637_v14, %v1288_v15  ;;  %v1435_v24 = vor.u32 %v1675_v23, %v1434_v22  ;;  %v1693_v29 = vld [vmem:[#allocation10 + $0x140] sm:$0xf0]  ;;  %v1410_v34 = vld [vmem:[#allocation10 + $0x78] sm:$0xf]  ;;  %v1695_v36 = vld [vmem:[#allocation10 + $0x154] sm:$0xf] }
  0x41   :  { %512 = vmatpush.bf16.msrb.mxu1 %v1347_v13  ;;  %490 = vmatpush.bf16.msra.mxu3 %v1295_v0  ;;  %v1227_v13 = vor.u32 %v1621_v10, %v1224_v11  ;;  %v1669_v35 = vld [vmem:[#allocation10 + $0x80] sm:$0xf0]  ;;  %v1520_v37 = vld [vmem:[#allocation10 + $0x15c] sm:$0xf0]  ;;  %v1507_v38 = vor.u32 %v1693_v29, %v1506_v27  ;;  %v1674_v40 = vld [vmem:[#allocation10 + $0xac] sm:$0xf] }
  0x42   :  { %477 = vmatpush.bf16.msra.mxu2 %v1223_v8  ;;  %v1523_v39 = vor.u32 %v1695_v36, %v1520_v37  ;;  %v1494_v42 = vld [vmem:[#allocation10 + $0x120] sm:$0xf]  ;;  %v1690_v43 = vld [vmem:[#allocation10 + $0x128] sm:$0xf0]  ;;  %v1692_v46 = vld [vmem:[#allocation10 + $0x13c] sm:$0xf] }
  0x43   :  { %v1398_v47 = vld [vmem:[#allocation10 + $0x60] sm:$0xf]  ;;  %v1666_v48 = vld [vmem:[#allocation10 + $0x68] sm:$0xf0]  ;;  %v1508_v49 = vld [vmem:[#allocation10 + $0x144] sm:$0xf0]  ;;  %v1495_v52 = vor.u32 %v1690_v43, %v1494_v42 }
  0x44   :  { %499 = vmatpush.bf16.msrb.mxu0 %v1275_v19  ;;  %v1518_v19 = vld [vmem:[#allocation10 + $0x150] sm:$0xf]  ;;  %v1671_v50 = vld [vmem:[#allocation10 + $0x94] sm:$0xf]  ;;  %v1424_v51 = vld [vmem:[#allocation10 + $0x9c] sm:$0xf0]  ;;  %v1511_v53 = vor.u32 %v1692_v46, %v1508_v49  ;;  %v1399_v57 = vor.u32 %v1666_v48, %v1398_v47 }
  0x45   :  { %513 = vmatpush.bf16.msrb.mxu1 %v1339_v20  ;;  %491 = vmatpush.bf16.msra.mxu3 %v1287_v12  ;;  %v1531_v20 = vor.u32 %v1699_v18, %v1530_v17  ;;  %v1427_v54 = vor.u32 %v1671_v50, %v1424_v51  ;;  %v1386_v58 = vld [vmem:[#allocation10 + $0x48] sm:$0xf]  ;;  %v1663_v59 = vld [vmem:[#allocation10 + $0x50] sm:$0xf0]  ;;  %v146_v61 = vld [vmem:[#allocation7] sm:$0x3] }
  0x46   :  { %864 = vmatpush.bf16.msrb.mxu2 %v1435_v24  ;;  %v1470_v63 = vld [vmem:[#allocation10 + $0xf0] sm:$0xf]  ;;  %v1684_v0 = vld [vmem:[#allocation10 + $0xf8] sm:$0xf0]  ;;  %v148_v3 = vperm.slane %v146_v61, 0  ;;  %v149_v5 = vperm.slane %v146_v61, 1 }
  0x47   :  { %v1458_v6 = vld [vmem:[#allocation10 + $0xd8] sm:$0xf]  ;;  %v1681_v7 = vld [vmem:[#allocation10 + $0xe0] sm:$0xf0]  ;;  %v1496_v22 = vld [vmem:[#allocation10 + $0x12c] sm:$0xf0] }
  0x48   :  { %500 = vmatpush.bf16.msrb.mxu0 %v1267_v25  ;;  %v1422_v25 = vld [vmem:[#allocation10 + $0x90] sm:$0xf]  ;;  %v1459_v9 = vor.u32 %v1681_v7, %v1458_v6  ;;  %v1668_v27 = vld [vmem:[#allocation10 + $0x7c] sm:$0xf]  ;;  %v1665_v42 = vld [vmem:[#allocation10 + $0x64] sm:$0xf] }
  0x49   :  { %514 = vmatpush.bf16.msrb.mxu1 %v1331_v26  ;;  %878 = vmatpush.bf16.msrb.mxu3 %v1531_v20  ;;  %v1519_v26 = vor.u32 %v1696_v21, %v1518_v19  ;;  %v1423_v30 = vor.u32 %v1672_v28, %v1422_v25  ;;  %v1689_v21 = vld [vmem:[#allocation10 + $0x124] sm:$0xf]  ;;  %v1374_v24 = vld [vmem:[#allocation10 + $0x30] sm:$0xf]  ;;  %v1660_v25 = vld [vmem:[#allocation10 + $0x38] sm:$0xf0] }
  0x4a   :  { %v1499_v23 = vor.u32 %v1689_v21, %v1496_v22  ;;  %v1412_v28 = vld [vmem:[#allocation10 + $0x84] sm:$0xf0]  ;;  %v1700_v37 = vld [vmem:[#allocation10 + $0x178] sm:$0xf0]  ;;  %v1400_v43 = vld [vmem:[#allocation10 + $0x6c] sm:$0xf0] }
  0x4b   :  { %865 = vmatpush.bf16.msrb.mxu2 %v1423_v30  ;;  %v1415_v29 = vor.u32 %v1668_v27, %v1412_v28  ;;  %v1446_v30 = vld [vmem:[#allocation10 + $0xc0] sm:$0xf]  ;;  %v1526_v48 = vld [vmem:[#allocation10 + $0x158] sm:$0xf]  ;;  %v1697_v49 = vld [vmem:[#allocation10 + $0x160] sm:$0xf0] }
  0x4c   :  { %501 = vmatpush.bf16.msrb.mxu0 %v1259_v31  ;;  %v1698_v31 = vld [vmem:[#allocation10 + $0x16c] sm:$0xf]  ;;  %v1472_v46 = vld [vmem:[#allocation10 + $0xfc] sm:$0xf0]  ;;  %v1527_v51 = vor.u32 %v1697_v49, %v1526_v48  ;;  %v1460_v61 = vld [vmem:[#allocation10 + $0xe4] sm:$0xf0] }
  0x4d   :  { %515 = vmatpush.bf16.msrb.mxu1 %v1323_v32  ;;  %v1532_v32 = vld [vmem:[#allocation10 + $0x174] sm:$0xf0]  ;;  %879 = vmatpush.bf16.msrb.mxu3 %v1519_v26  ;;  %v1375_v26 = vor.u32 %v1660_v25, %v1374_v24  ;;  %v1350_v50 = vld [vmem:[#allocation10] sm:$0xf]  ;;  %v1673_v6 = vld [vmem:[#allocation10 + $0xa0] sm:$0xf0] }
  0x4e   :  { %v1535_v33 = vor.u32 %v1698_v31, %v1532_v32  ;;  %v1678_v31 = vld [vmem:[#allocation10 + $0xc8] sm:$0xf0]  ;;  %v1656_v22 = vld [vmem:[#allocation10 + $0x1c] sm:$0xf]  ;;  %v1418_v24 = vld [vmem:[#allocation10 + $0x80] sm:$0xf] }
  0x4f   :  { %v1447_v32 = vor.u32 %v1678_v31, %v1446_v30  ;;  %v1490_v28 = vld [vmem:[#allocation10 + $0x110] sm:$0xf]  ;;  %v1653_v31 = vld [vmem:[#allocation10 + $0x4] sm:$0xf]  ;;  %v1454_v48 = vld [vmem:[#allocation10 + $0xc8] sm:$0xf] }
  0x50   :  { %502 = vmatpush.bf16.msrb.mxu0 %v1251_v41  ;;  %v1436_v41 = vld [vmem:[#allocation10 + $0xb4] sm:$0xf0]  ;;  %v1679_v49 = vld [vmem:[#allocation10 + $0xd0] sm:$0xf0]  ;;  %s1134_s29 = sshll.u32 %s1922_s28, 4  ;;  %s1136_s12 = sshll.u32 %s2058_s10, 4  ;;  %s1135_s29 = int_to_ptr.vmem [resolvable:$true] %s1134_s29  ;;  %s1137_s12 = int_to_ptr.hbm [resolvable:$true] %s1136_s12 }
  0x51   :  { %516 = vmatpush.bf16.msrb.mxu1 %v1315_v44  ;;  %v1411_v44 = vor.u32 %v1669_v35, %v1410_v34  ;;  %v1439_v45 = vor.u32 %v1674_v40, %v1436_v41  ;;  %880 = vmatpush.bf16.msrb.mxu3 %v1507_v38  ;;  %v1484_v34 = vld [vmem:[#allocation10 + $0x114] sm:$0xf0]  ;;  %v1538_v35 = vld [vmem:[#allocation10 + $0x170] sm:$0xf] }
  0x52   :  { %v1362_v38 = vld [vmem:[#allocation10 + $0x18] sm:$0xf]  ;;  %v1539_v40 = vor.u32 %v1700_v37, %v1538_v35  ;;  %v1667_v35 = vld [vmem:[#allocation10 + $0x70] sm:$0xf0]  ;;  %v1685_v37 = vld [vmem:[#allocation10 + $0x100] sm:$0xf0] }
  0x53   :  { %866 = vmatpush.bf16.msrb.mxu2 %v1411_v44  ;;  %v1403_v44 = vor.u32 %v1665_v42, %v1400_v43  ;;  %v1466_v43 = vld [vmem:[#allocation10 + $0xe0] sm:$0xf] }
  0x54   :  { %503 = vmatpush.bf16.msrb.mxu0 %v1243_v55  ;;  %v1482_v55 = vld [vmem:[#allocation10 + $0x108] sm:$0xf] }
  0x55   :  { %517 = vmatpush.bf16.msrb.mxu1 %v1307_v56  ;;  %v1687_v56 = vld [vmem:[#allocation10 + $0x110] sm:$0xf0]  ;;  %881 = vmatpush.bf16.msrb.mxu3 %v1495_v52  ;;  %v1654_v52 = vld [vmem:[#allocation10 + $0x8] sm:$0xf0] }
  0x56   :  { %v1483_v60 = vor.u32 %v1687_v56, %v1482_v55  ;;  %v1351_v55 = vor.u32 %v1654_v52, %v1350_v50  ;;  %v304_v50 = vld [vmem:[%s2052_s4] sm:$0x3]  ;;  %v1370_v52 = vld [vmem:[#allocation10 + $0x20] sm:$0xf] }
  0x57   :  { %867 = vmatpush.bf16.msrb.mxu2 %v1399_v57  ;;  %v1442_v57 = vld [vmem:[#allocation10 + $0xb0] sm:$0xf] }
  0x58   :  { %504 = vmatpush.bf16.msrb.mxu0 %v1235_v1  ;;  %v1387_v1 = vor.u32 %v1663_v59, %v1386_v58  ;;  %v1676_v58 = vld [vmem:[#allocation10 + $0xb8] sm:$0xf0] }
  0x59   :  { %518 = vmatpush.bf16.msrb.mxu1 %v1299_v4  ;;  %882 = vmatpush.bf16.msrb.mxu3 %v1483_v60  ;;  %v1471_v4 = vor.u32 %v1684_v0, %v1470_v63  ;;  %v1443_v59 = vor.u32 %v1676_v58, %v1442_v57  ;;  %v1680_v60 = vld [vmem:[#allocation10 + $0xdc] sm:$0xf]  ;;  %v1694_v0 = vld [vmem:[#allocation10 + $0x148] sm:$0xf0] }
  0x5a   :  { %v1463_v63 = vor.u32 %v1680_v60, %v1460_v61  ;;  %v1358_v60 = vld [vmem:[#allocation10 + $0x8] sm:$0xf]  ;;  %v1655_v61 = vld [vmem:[#allocation10 + $0x10] sm:$0xf0] }
  0x5b   :  { %868 = vmatpush.bf16.msrb.mxu2 %v1387_v1 }
  0x5c   :  { %505 = vmatpush.bf16.msrb.mxu0 %v1227_v13 }
  0x5d   :  { %519 = vmatpush.bf16.msrb.mxu1 %v1291_v16  ;;  %883 = vmatpush.bf16.msrb.mxu3 %v1471_v4  ;;  %v1430_v4 = vld [vmem:[#allocation10 + $0x98] sm:$0xf] }
  0x5e   :  { %v1431_v7 = vor.u32 %v1673_v6, %v1430_v4  ;;  %v1708_v6 = vld [vmem:[#allocation11 + $0x38] sm:$0xff] }
  0x5f   :  { %869 = vmatpush.bf16.msrb.mxu2 %v1375_v26  ;;  %v1670_v26 = vld [vmem:[#allocation10 + $0x88] sm:$0xf0] }
  0x60   :  { %892 = vmatpush.bf16.msra.mxu0 %v1439_v45  ;;  %v1683_v45 = vld [vmem:[#allocation10 + $0xf4] sm:$0xf]  ;;  %v1419_v27 = vor.u32 %v1670_v26, %v1418_v24 }
  0x61   :  { %906 = vmatpush.bf16.msra.mxu1 %v1535_v33  ;;  %884 = vmatpush.bf16.msrb.mxu3 %v1459_v9  ;;  %v1686_v33 = vld [vmem:[#allocation10 + $0x10c] sm:$0xf]  ;;  %v1475_v47 = vor.u32 %v1683_v45, %v1472_v46  ;;  %v1677_v9 = vld [vmem:[#allocation10 + $0xc4] sm:$0xf]  ;;  %v1382_v45 = vld [vmem:[#allocation10 + $0x38] sm:$0xf] }
  0x62   :  { %v1487_v36 = vor.u32 %v1686_v33, %v1484_v34  ;;  %v1406_v33 = vld [vmem:[#allocation10 + $0x68] sm:$0xf] }
  0x64   :  { %893 = vmatpush.bf16.msra.mxu0 %v1427_v54  ;;  %v1388_v54 = vld [vmem:[#allocation10 + $0x54] sm:$0xf0] }
  0x65   :  { %907 = vmatpush.bf16.msra.mxu1 %v1523_v39  ;;  %v1657_v39 = vld [vmem:[#allocation10 + $0x20] sm:$0xf0]  ;;  %885 = vmatpush.bf16.msrb.mxu3 %v1447_v32  ;;  %v1352_v32 = vld [vmem:[#allocation10 + $0xc] sm:$0xf0] }
  0x66   :  { %v1363_v41 = vor.u32 %v1657_v39, %v1362_v38  ;;  %v1355_v34 = vor.u32 %v1653_v31, %v1352_v32  ;;  %v1407_v38 = vor.u32 %v1667_v35, %v1406_v33  ;;  %v1703_v32 = vld [vmem:[#allocation11 + $0x10] sm:$0xff]  ;;  %v1716_v33 = vld [vmem:[#allocation11 + $0x78] sm:$0xff] }
  0x67   :  { %v1712_v35 = vld [vmem:[#allocation11 + $0x58] sm:$0xff] }
  0x68   :  { %894 = vmatpush.bf16.msra.mxu0 %v1415_v29  ;;  %870 = vmatpush.bf16.msrb.mxu2 %v1363_v41  ;;  %v1688_v29 = vld [vmem:[#allocation10 + $0x118] sm:$0xf0] }
  0x69   :  { %908 = vmatpush.bf16.msra.mxu1 %v1511_v53  ;;  %v1662_v53 = vld [vmem:[#allocation10 + $0x4c] sm:$0xf]  ;;  %v1491_v30 = vor.u32 %v1688_v29, %v1490_v28  ;;  %v1664_v41 = vld [vmem:[#allocation10 + $0x58] sm:$0xf0] }
  0x6a   :  { %v1391_v56 = vor.u32 %v1662_v53, %v1388_v54  ;;  %v1658_v53 = vld [vmem:[#allocation10 + $0x28] sm:$0xf0]  ;;  %v1455_v54 = vor.u32 %v1679_v49, %v1454_v48 }
  0x6b   :  { %v1371_v57 = vor.u32 %v1658_v53, %v1370_v52  ;;  %v1730_v52 = vld [vmem:[%s2055_s7] ss:$0 sm:$0xff] }
  0x6c   :  { %895 = vmatpush.bf16.msra.mxu0 %v1403_v44  ;;  %871 = vmatpush.bf16.msrb.mxu2 %v1351_v55  ;;  %v1682_v44 = vld [vmem:[#allocation10 + $0xe8] sm:$0xf0]  ;;  %v307_v55 = vperm.slane %v304_v50, 1 }
  0x6d   :  { %909 = vmatpush.bf16.msra.mxu1 %v1499_v23  ;;  %v1364_v23 = vld [vmem:[#allocation10 + $0x24] sm:$0xf0]  ;;  %v1467_v46 = vor.u32 %v1682_v44, %v1466_v43  ;;  %v1709_v44 = vld [vmem:[#allocation11 + $0x40] sm:$0xff] }
  0x6e   :  { %v1367_v25 = vor.u32 %v1656_v22, %v1364_v23 }
  0x70   :  { %896 = vmatpush.bf16.msra.mxu0 %v1391_v56 }
  0x71   :  { %910 = vmatpush.bf16.msra.mxu1 %v1487_v36  ;;  %v1478_v36 = vld [vmem:[#allocation10 + $0xf8] sm:$0xf] }
  0x72   :  { %v1479_v39 = vor.u32 %v1685_v37, %v1478_v36  ;;  %v1711_v36 = vld [vmem:[#allocation11 + $0x50] sm:$0xff] }
  0x73   :  { %v600_v37 = vld [vmem:[%s2054_s6] sm:$0x7] }
  0x74   :  { %v602_v43 = vperm.slane %v600_v37, 0 }
  0x75   :  { %911 = vmatpush.bf16.msra.mxu1 %v1475_v47  ;;  %v1661_v47 = vld [vmem:[#allocation10 + $0x40] sm:$0xf0] }
  0x79   :  { %912 = vmatpush.bf16.msra.mxu1 %v1463_v63  ;;  %v306_v63 = vperm.slane %v304_v50, 0 }
  0xbc   :  { %v247_v62 = vpop.f32.mrf.mxu0 }
  0xbd   :  { %v261_v2 = vpop.f32.mrf.mxu1  ;;  %v2002_v8 = vadd.f32 %v247_v62, %v148_v3  ;;  %v1514_v62 = vld [vmem:[#allocation10 + $0x140] sm:$0xf] }
  0xbe   :  { %v2004_v10 = vadd.f32 %v261_v2, %v149_v5  ;;  %v1515_v1 = vor.u32 %v1694_v0, %v1514_v62  ;;  %v1659_v2 = vld [vmem:[#allocation10 + $0x34] sm:$0xf]  ;;  %v1359_v62 = vor.u32 %v1655_v61, %v1358_v60 }
  0xbf   :  { %v266_v15 = vmax.f32 %v2002_v8, 0.0  ;;  %v1702_v8 = vld [vmem:[#allocation11 + $0x8] sm:$0xff] }
  0xc0   :  { %v267_v17 = vmax.f32 %v2004_v10, 0.0 }
  0xc4   :  { %v249_v11 = vpop.f32.mrf.mxu0 }
  0xc5   :  { %v2006_v12 = vadd.f32 %v249_v11, %v148_v3  ;;  %v263_v13 = vpop.f32.mrf.mxu1  ;;  %v1376_v3 = vld [vmem:[#allocation10 + $0x3c] sm:$0xf0]  ;;  %v1448_v11 = vld [vmem:[#allocation10 + $0xcc] sm:$0xf0] }
  0xc6   :  { %v2008_v14 = vadd.f32 %v263_v13, %v149_v5  ;;  %v1379_v5 = vor.u32 %v1659_v2, %v1376_v3  ;;  %v1502_v13 = vld [vmem:[#allocation10 + $0x128] sm:$0xf] }
  0xc7   :  { %v268_v16 = vmax.f32 %v2006_v12, 0.0  ;;  %v1701_v12 = vld [vmem:[#allocation11] sm:$0xff] }
  0xc8   :  { %v269_v18 = vmax.f32 %v2008_v14, 0.0  ;;  %897 = vmatpush.bf16.msra.mxu0 %v1379_v5  ;;  %v1706_v14 = vld [vmem:[#allocation11 + $0x28] sm:$0xff] }
  0xc9   :  { %v270_v19 = vpack.c.bf16 %v268_v16, %v266_v15 }
  0xca   :  { %v271_v20 = vpack.c.bf16 %v269_v18, %v267_v17 }
  0xcb   :  { %478 = vmatmul.bf16.vlgmr.msra.gmra.mxu2 %v270_v19  ;;  %506 = vmatmul.bf16.vlgmr.msrb.gmra.mxu0 %v270_v19  ;;  %v1451_v19 = vor.u32 %v1677_v9, %v1448_v11 }
  0xcc   :  { %492 = vmatmul.bf16.vlgmr.msra.gmra.mxu3 %v271_v20  ;;  %520 = vmatmul.bf16.vlgmr.msrb.gmra.mxu1 %v271_v20  ;;  %v1691_v20 = vld [vmem:[#allocation10 + $0x130] sm:$0xf0] }
  0xcd   :  { %934 = vmatpush.bf16.msra.mxu3 %v1539_v40  ;;  %920 = vmatpush.bf16.msra.mxu2 %v1443_v59  ;;  %v1503_v21 = vor.u32 %v1691_v20, %v1502_v13  ;;  %v1394_v40 = vld [vmem:[#allocation10 + $0x50] sm:$0xf] }
  0xce   :  { %913 = vmatpush.bf16.msra.mxu1 %v1451_v19  ;;  %898 = vmatpush.bf16.msra.mxu0 %v1367_v25  ;;  %v1395_v42 = vor.u32 %v1664_v41, %v1394_v40  ;;  %v1707_v13 = vld [vmem:[#allocation11 + $0x30] sm:$0xff]  ;;  %v603_v41 = vperm.slane %v600_v37, 1 }
  0xd1   :  { %935 = vmatpush.bf16.msra.mxu3 %v1527_v51  ;;  %921 = vmatpush.bf16.msra.mxu2 %v1431_v7  ;;  %v1383_v51 = vor.u32 %v1661_v47, %v1382_v45 }
  0xd2   :  { %899 = vmatpush.bf16.msra.mxu0 %v1355_v34  ;;  %1112 = vmatpush.bf16.msrb.mxu1 %v1716_v33  ;;  %v1713_v34 = vld [vmem:[#allocation11 + $0x60] sm:$0xff] }
  0xd5   :  { %936 = vmatpush.bf16.msra.mxu3 %v1515_v1  ;;  %922 = vmatpush.bf16.msra.mxu2 %v1419_v27 }
  0xd6   :  { %1098 = vmatpush.bf16.msrb.mxu0 %v1708_v6 }
  0xd9   :  { %937 = vmatpush.bf16.msra.mxu3 %v1503_v21  ;;  %923 = vmatpush.bf16.msra.mxu2 %v1407_v38  ;;  %v1710_v38 = vld [vmem:[#allocation11 + $0x48] sm:$0xff] }
  0xda   :  { %1099 = vmatpush.bf16.msrb.mxu0 %v1707_v13 }
  0xdd   :  { %938 = vmatpush.bf16.msra.mxu3 %v1491_v30  ;;  %924 = vmatpush.bf16.msra.mxu2 %v1395_v42 }
  0xde   :  { %1100 = vmatpush.bf16.msrb.mxu0 %v1706_v14 }
  0xe1   :  { %939 = vmatpush.bf16.msra.mxu3 %v1479_v39  ;;  %925 = vmatpush.bf16.msra.mxu2 %v1383_v51 }
  0xe5   :  { %940 = vmatpush.bf16.msra.mxu3 %v1467_v46  ;;  %926 = vmatpush.bf16.msra.mxu2 %v1371_v57 }
  0xe9   :  { %941 = vmatpush.bf16.msra.mxu3 %v1455_v54  ;;  %927 = vmatpush.bf16.msra.mxu2 %v1359_v62 }
 0x148   :  { %v507_v56 = vpop.f32.mrf.mxu0 }
 0x149   :  { %v521_v58 = vpop.f32.mrf.mxu1  ;;  %v508_v59 = vadd.f32 %v507_v56, %v307_v55 }
 0x14b   :  { %v522_v1 = vadd.f32 %v521_v58, %v508_v59 }
 0x14d   :  { %v527_v9 = vmax.f32 %v522_v1, 0.0 }
 0x14e   :  { %v479_v0 = vpop.f32.mrf.mxu2 }
 0x14f   :  { %v493_v2 = vpop.f32.mrf.mxu3  ;;  %v480_v4 = vadd.f32 %v479_v0, %v306_v63  ;;  %v531_v22 = vadd.f32 %v527_v9, %v267_v17  ;;  %v1705_v17 = vld [vmem:[#allocation11 + $0x20] sm:$0xff] }
 0x150   :  { %v509_v3 = vpop.f32.mrf.mxu0  ;;  %1101 = vmatpush.bf16.msrb.mxu0 %v1705_v17 }
 0x151   :  { %v510_v5 = vadd.f32 %v509_v3, %v307_v55  ;;  %v523_v7 = vpop.f32.mrf.mxu1  ;;  %v494_v19 = vadd.f32 %v493_v2, %v480_v4  ;;  %v604_v4 = vperm.slane %v600_v37, 2 }
 0x153   :  { %v524_v11 = vadd.f32 %v523_v7, %v510_v5  ;;  %v526_v26 = vmax.f32 %v494_v19, 0.0 }
 0x155   :  { %v529_v20 = vmax.f32 %v524_v11, 0.0  ;;  %v530_v30 = vadd.f32 %v526_v26, %v266_v15  ;;  %v1715_v15 = vld [vmem:[#allocation11 + $0x70] sm:$0xff] }
 0x156   :  { %v481_v21 = vpop.f32.mrf.mxu2  ;;  %1113 = vmatpush.bf16.msrb.mxu1 %v1715_v15 }
 0x157   :  { %v533_v23 = vadd.f32 %v529_v20, %v269_v18  ;;  %v482_v24 = vadd.f32 %v481_v21, %v306_v63  ;;  %v495_v25 = vpop.f32.mrf.mxu3  ;;  %v1704_v18 = vld [vmem:[#allocation11 + $0x18] sm:$0xff] }
 0x158   :  { %1102 = vmatpush.bf16.msrb.mxu0 %v1704_v18 }
 0x159   :  { %v496_v27 = vadd.f32 %v495_v25, %v482_v24  ;;  %v535_v28 = vpack.c.bf16 %v533_v23, %v531_v22  ;;  %v1731_v23 = vld [vmem:[%s2057_s9] ss:$0 sm:$0xff] }
 0x15b   :  { %v528_v29 = vmax.f32 %v496_v27, 0.0  ;;  %886 = vmatmul.bf16.vlgmr.msrb.gmra.mxu3 %v535_v28  ;;  %914 = vmatmul.bf16.vlgmr.msra.gmra.mxu1 %v535_v28 }
 0x15c   :  { %1103 = vmatpush.bf16.msrb.mxu0 %v1703_v32 }
 0x15d   :  { %v532_v31 = vadd.f32 %v528_v29, %v268_v16  ;;  %v1714_v16 = vld [vmem:[#allocation11 + $0x68] sm:$0xff] }
 0x15e   :  { %1114 = vmatpush.bf16.msrb.mxu1 %v1714_v16 }
 0x15f   :  { %v534_v10 = vpack.c.bf16 %v532_v31, %v530_v30 }
 0x160   :  { %1104 = vmatpush.bf16.msrb.mxu0 %v1702_v8 }
 0x161   :  { %872 = vmatmul.bf16.vlgmr.msrb.gmra.mxu2 %v534_v10  ;;  %900 = vmatmul.bf16.vlgmr.msra.gmra.mxu0 %v534_v10 }
 0x162   :  { %1115 = vmatpush.bf16.msrb.mxu1 %v1713_v34 }
 0x164   :  { %1105 = vmatpush.bf16.msrb.mxu0 %v1701_v12 }
 0x166   :  { %1116 = vmatpush.bf16.msrb.mxu1 %v1712_v35 }
 0x16a   :  { %1117 = vmatpush.bf16.msrb.mxu1 %v1711_v36 }
 0x16b   :  { %942 = vmatmul.bf16.vlgmr.msra.gmra.mxu3 %v535_v28 }
 0x16e   :  { %1118 = vmatpush.bf16.msrb.mxu1 %v1710_v38 }
 0x171   :  { %928 = vmatmul.bf16.vlgmr.msra.gmra.mxu2 %v534_v10 }
 0x172   :  { %1119 = vmatpush.bf16.msrb.mxu1 %v1709_v44 }
 0x1d8   :  { %v915_v39 = vpop.f32.mrf.mxu1 }
 0x1de   :  { %v901_v40 = vpop.f32.mrf.mxu0  ;;  %v887_v42 = vpop.f32.mrf.mxu3 }
 0x1df   :  { %v902_v45 = vadd.f32 %v901_v40, %v603_v41 }
 0x1e0   :  { %v917_v53 = vpop.f32.mrf.mxu1 }
 0x1e1   :  { %v916_v49 = vadd.f32 %v915_v39, %v902_v45 }
 0x1e3   :  { %v949_v57 = vmax.f32 %v916_v49, 0.0 }
 0x1e4   :  { %v873_v46 = vpop.f32.mrf.mxu2 }
 0x1e5   :  { %v874_v47 = vadd.f32 %v873_v46, %v602_v43 }
 0x1e6   :  { %v903_v48 = vpop.f32.mrf.mxu0  ;;  %v889_v56 = vpop.f32.mrf.mxu3 }
 0x1e7   :  { %v904_v50 = vadd.f32 %v903_v48, %v603_v41  ;;  %v888_v51 = vadd.f32 %v887_v42, %v874_v47 }
 0x1e9   :  { %v918_v54 = vadd.f32 %v917_v53, %v904_v50  ;;  %v948_v55 = vmax.f32 %v888_v51, 0.0 }
 0x1eb   :  { %v952_v58 = vmax.f32 %v918_v54, 0.0  ;;  %v958_v59 = vmul.f32 %v1730_v52, %v948_v55 }
 0x1ec   :  { %v875_v60 = vpop.f32.mrf.mxu2 }
 0x1ed   :  { %v964_v61 = vpack.c.bf16 %v952_v58, %v949_v57  ;;  %v876_v62 = vadd.f32 %v875_v60, %v602_v43  ;;  %960 = vadd.xlane.f32.xlu0 %v958_v59 }
 0x1ee   :  { %v943_v2 = vpop.f32.mrf.mxu3 }
 0x1ef   :  { %v890_v63 = vadd.f32 %v889_v56, %v876_v62  ;;  %1106 = vmatmul.bf16.vlgmr.msrb.gmra.mxu0 %v964_v61 }
 0x1f1   :  { %v951_v0 = vmax.f32 %v890_v63, 0.0 }
 0x1f3   :  { %v959_v1 = vmul.f32 %v1730_v52, %v951_v0 }
 0x1f4   :  { %v929_v3 = vpop.f32.mrf.mxu2 }
 0x1f5   :  { %962 = vadd.xlane.f32.xlu0 %v959_v1  ;;  %v930_v5 = vadd.f32 %v929_v3, %v604_v4 }
 0x1f6   :  { %v945_v11 = vpop.f32.mrf.mxu3 }
 0x1f7   :  { %v944_v7 = vadd.f32 %v943_v2, %v930_v5 }
 0x1f9   :  { %v950_v19 = vmax.f32 %v944_v7, 0.0 }
 0x1fc   :  { %v931_v6 = vpop.f32.mrf.mxu2 }
 0x1fd   :  { %v932_v9 = vadd.f32 %v931_v6, %v604_v4 }
 0x1ff   :  { %v946_v13 = vadd.f32 %v945_v11, %v932_v9 }
 0x201   :  { %v953_v20 = vmax.f32 %v946_v13, 0.0 }
 0x203   :  { %v965_v21 = vpack.c.bf16 %v953_v20, %v950_v19 }
 0x205   :  { %1120 = vmatmul.bf16.vlgmr.msrb.gmra.mxu1 %v965_v21 }
 0x260   :  { %v961_v25 = vpop.xlane.xlu0 %960 }
 0x268   :  { %v963_v14 = vpop.xlane.xlu0 %962 }
 0x26c   :  { %v1107_v22 = vpop.f32.mrf.mxu0 }
 0x26d   :  { %v1108_v24 = vadd.f32 %v1731_v23, %v1107_v22 }
 0x274   :  { %v1109_v29 = vpop.f32.mrf.mxu0 }
 0x275   :  { %v1110_v30 = vadd.f32 %v1731_v23, %v1109_v29 }
 0x282   :  { %v1121_v26 = vpop.f32.mrf.mxu1 }
 0x283   :  { %v1122_v27 = vadd.f32 %v1121_v26, %v1108_v24 }
 0x285   :  { %v1126_v28 = vadd.f32 %v1122_v27, %v961_v25 }
 0x287   :  { %1128 = vst [vmem:[#allocation13] sm:$0xff] %v1126_v28 }
 0x28a   :  { %v1123_v31 = vpop.f32.mrf.mxu1 }
 0x28b   :  { %v1124_v10 = vadd.f32 %v1123_v31, %v1110_v30 }
 0x28d   :  { %v1127_v17 = vadd.f32 %v1124_v10, %v963_v14 }
 0x28f   :  { %1129 = vst [vmem:[#allocation13 + $0x8] sm:$0xff] %v1127_v17 }
 0x290   :  { %1142 = dma.vmem_to_hbm [thread:$0]  %s1135_s29, 256, %s1137_s12, [#allocation4], %s1911_s21, %s1911_s21, %s1912_s22  }
 0x291   :  { %1908 = dma.done.wait [#allocation4], 256  }
 0x292   :  { %1909 = vsyncadd [#allocation4], 4294967040 }
 0x293   :  { %1147 = vsyncpa [#allocation3], 1 }
 0x294   :  { %1148 = vsyncpa [#allocation6], 1 }
 0x295   :  { %1149 = vsyncpa [#allocation9], 1 }
 0x296   :  { %1150 = vsyncpa [#allocation12], 1 }
 0x297   :  { %1151 = vsyncpa [#allocation4], 1 }

</bundles_post_ra>
